<compile_context>
chip_gen: v5e
topology: v5e:2x2
jax: 0.10.0
libtpu: 0.0.40
codegen_flags: <defaults>
</compile_context>

<pallas_src>
import functools
import math

import jax
import jax.numpy as jnp
from jax.experimental import pallas as pl
from jax.experimental.pallas import tpu as pltpu


# ------------------------------ helpers (traced inside kernels) ------------

def _ln(x, g, b, eps):
    mu = jnp.mean(x, axis=-1, keepdims=True)
    var = jnp.mean(jnp.square(x - mu), axis=-1, keepdims=True)
    return (x - mu) * jax.lax.rsqrt(var + eps) * g + b


def _gelu(x):
    # TODO(synk): BERT reference uses erf-GELU; tanh approximation differs by <1e-3.
    return 0.5 * x * (1.0 + jnp.tanh(0.7978845608028654 * (x + 0.044715 * x * x * x)))


# ------------------------------ Pallas kernels ------------------------------

def _layernorm_kernel(x_ref, g_ref, b_ref, o_ref, *, eps):
    """LayerNorm over last axis for one row-tile (embedding LN, no residual)."""
    o_ref[...] = _ln(x_ref[...], g_ref[...], b_ref[...], eps).astype(o_ref.dtype)


def _encoder_stack_kernel(x_ref, bias_ref, wqkv_ref, bqkv_ref, wo_ref, bo_ref,
                          ln1g_ref, ln1b_ref, wi_ref, bi_ref, wf_ref, bf_ref,
                          ln2g_ref, ln2b_ref, o_ref, xres_ref, *, nh, eps):
    """One (batch, layer) grid step of the fused BERT encoder stack.

    The activation for the current batch element is carried across the layer
    axis in the VMEM scratch `xres_ref`; HBM is touched only at layer 0 (read
    the embedding output) and the last layer (write the final hidden states).
    """
    S, H = o_ref.shape
    dh = H // nh
    layer = pl.program_id(1)

    @pl.when(layer == 0)
    def _():
        xres_ref[...] = x_ref[...]          # seed the resident activation

    x = xres_ref[...]                        # (S, H) f32, resident in VMEM

    # Fused Q|K|V projection (1/sqrt(dh) already folded into the Q columns).
    qkv = jnp.dot(x.astype(jnp.bfloat16), wqkv_ref[0],
                  preferred_element_type=jnp.float32) + bqkv_ref[0]   # (S, 3H)
    qkv_b = qkv.astype(jnp.bfloat16)         # single bf16 cast for all heads

    # Mask broadcast hoisted out of the per-head loop (one broadcast, not nh).
    bias_full = pl.broadcast_to(bias_ref[0], (S, S))                  # (S, S)

    # Per-head attention; contexts gathered into one (S, H) bf16 tile so the
    # output projection runs as a single full-width (K = H) MXU matmul.
    ctx_heads = []
    for h in range(nh):
        q = qkv_b[:, h * dh:(h + 1) * dh]
        k = qkv_b[:, H + h * dh:H + (h + 1) * dh]
        v = qkv_b[:, 2 * H + h * dh:2 * H + (h + 1) * dh]
        s = jax.lax.dot_general(q, k, (((1,), (1,)), ((), ())),
                                preferred_element_type=jnp.float32)
        s = s + bias_full
        s = s - jnp.max(s, axis=-1, keepdims=True)
        p = jnp.exp(s)
        p = p * pl.reciprocal(jnp.sum(p, axis=-1, keepdims=True), approx=True)
        ctx_heads.append(
            jnp.dot(p.astype(jnp.bfloat16), v,
                    preferred_element_type=jnp.float32).astype(jnp.bfloat16))
    ctx = jnp.concatenate(ctx_heads, axis=-1)                         # (S, H)

    attn = jnp.dot(ctx, wo_ref[0], preferred_element_type=jnp.float32) + bo_ref[0]
    # dropout(p=0.1): identity in eval mode

    x1 = _ln(attn + x, ln1g_ref[0], ln1b_ref[0], eps)

    inter = _gelu(jnp.dot(x1.astype(jnp.bfloat16), wi_ref[0],
                          preferred_element_type=jnp.float32) + bi_ref[0])
    ffn = jnp.dot(inter.astype(jnp.bfloat16), wf_ref[0],
                  preferred_element_type=jnp.float32) + bf_ref[0]
    # dropout(p=0.1): identity in eval mode

    new_x = _ln(ffn + x1, ln2g_ref[0], ln2b_ref[0], eps)
    xres_ref[...] = new_x

    @pl.when(layer == pl.num_programs(1) - 1)
    def _():
        o_ref[...] = new_x.astype(o_ref.dtype)


def _head_kernel(*refs, hidden, has_numeric):
    """Fused pooler (tanh linear on CLS) + numeric-feature concat + regressor."""
    if has_numeric:
        cls_ref, num_ref, pw_ref, pb_ref, rw_ref, rb_ref, o_ref = refs
    else:
        cls_ref, pw_ref, pb_ref, rw_ref, rb_ref, o_ref = refs

    pooled = jnp.tanh(jnp.dot(cls_ref[...].astype(jnp.bfloat16), pw_ref[...],
                              preferred_element_type=jnp.float32) + pb_ref[...])
    # dropout(p=0.1): identity in eval mode

    rw = rw_ref[...]                         # (out_dim, hidden[+numeric_dim])
    out_dim = rw.shape[0]
    if out_dim == 1:
        # out_dim = 1: VPU reduction instead of a 0%-lane-fill MXU matmul.
        out = jnp.sum(pooled * rw[:, :hidden], axis=-1, keepdims=True)
        if has_numeric:
            out = out + jnp.sum(num_ref[...] * rw[:, hidden:],
                                axis=-1, keepdims=True)
    else:
        out = jax.lax.dot_general(pooled, rw[:, :hidden], (((1,), (1,)), ((), ())),
                                  preferred_element_type=jnp.float32)
        if has_numeric:
            out = out + jax.lax.dot_general(num_ref[...], rw[:, hidden:],
                                            (((1,), (1,)), ((), ())),
                                            preferred_element_type=jnp.float32)
    o_ref[...] = (out + rb_ref[...]).astype(o_ref.dtype)


# ------------------------------ pallas_call wrappers ------------------------

def layernorm(x, g, b, eps=1e-12):
    M, H = x.shape
    row_tile = M
    for cand in (1024, 512, 256):            # tile rows at realistic sizes
        if M % cand == 0:
            row_tile = cand
            break
    return pl.pallas_call(
        functools.partial(_layernorm_kernel, eps=eps),
        out_shape=jax.ShapeDtypeStruct((M, H), jnp.float32),
        grid=(M // row_tile,),
        in_specs=[pl.BlockSpec((row_tile, H), lambda i: (i, 0)),
                  pl.BlockSpec((1, H), lambda i: (0, 0)),
                  pl.BlockSpec((1, H), lambda i: (0, 0))],
        out_specs=pl.BlockSpec((row_tile, H), lambda i: (i, 0)),
        compiler_params=pltpu.CompilerParams(dimension_semantics=("parallel",)),
    )(x, g, b)


def encoder_stack(x, bias3, enc, *, B, S, L, nh, eps=1e-12):
    """All L encoder layers in one pallas_call; grid = (batch, layer)."""
    M, H = x.shape
    names = ("wqkv", "bqkv", "wo", "bo", "ln1_g", "ln1_b",
             "wi", "bi", "wf", "bf", "ln2_g", "ln2_b")
    weights = [enc[n] for n in names]        # each (L, r, c)

    def wspec(a):
        r, c = a.shape[1], a.shape[2]
        return pl.BlockSpec((1, r, c), lambda b, l: (l, 0, 0))

    return pl.pallas_call(
        functools.partial(_encoder_stack_kernel, nh=nh, eps=eps),
        out_shape=jax.ShapeDtypeStruct((M, H), jnp.float32),
        grid=(B, L),
        in_specs=[
            pl.BlockSpec((S, H), lambda b, l: (b, 0)),       # embeddings (read at l==0)
            pl.BlockSpec((1, 1, S), lambda b, l: (b, 0, 0)),  # additive mask row
        ] + [wspec(a) for a in weights],
        out_specs=pl.BlockSpec((S, H), lambda b, l: (b, 0)),  # resident per batch
        scratch_shapes=[pltpu.VMEM((S, H), jnp.float32)],      # layer-to-layer carry
        compiler_params=pltpu.CompilerParams(
            dimension_semantics=("parallel", "arbitrary"),
            # explicit budget; fits v7x's 64 MiB physical VMEM at these shapes
            vmem_limit_bytes=64 * 1024 * 1024),
    )(x, bias3, *weights)


def regression_head(cls, numeric, pool_w, pool_b, reg_wt, reg_b):
    B, H = cls.shape
    out_dim = reg_wt.shape[0]
    if numeric is None:
        return pl.pallas_call(
            functools.partial(_head_kernel, hidden=H, has_numeric=False),
            out_shape=jax.ShapeDtypeStruct((B, out_dim), jnp.float32),
        )(cls, pool_w, pool_b, reg_wt, reg_b)
    return pl.pallas_call(
        functools.partial(_head_kernel, hidden=H, has_numeric=True),
        out_shape=jax.ShapeDtypeStruct((B, out_dim), jnp.float32),
    )(cls, numeric.astype(jnp.float32), pool_w, pool_b, reg_wt, reg_b)


# ------------------------------ Model (glue) --------------------------------

class Config:
    vocab_size = 32
    hidden = 32
    num_layers = 2
    num_heads = 2
    intermediate = 64
    max_pos = 16
    type_vocab = 2
    numeric_dim = 4
    output_dim = 1


def init_params(key, cfg):
    std = 0.02
    H, I, L = cfg.hidden, cfg.intermediate, cfg.num_layers
    dh = H // cfg.num_heads
    scale = 1.0 / math.sqrt(dh)

    keys = iter(jax.random.split(key, 8 + 6 * L))

    def nrm(shape):
        return std * jax.random.normal(next(keys), shape, dtype=jnp.float32)

    wqkv_l, wo_l, wi_l, wf_l = [], [], [], []
    for _ in range(L):
        # 1/sqrt(dh) attention scale folded into the Q weight (and Q bias, zero here).
        wq = nrm((H, H)) * scale
        wk = nrm((H, H))
        wv = nrm((H, H))
        wqkv_l.append(jnp.concatenate([wq, wk, wv], axis=-1).astype(jnp.bfloat16))
        wo_l.append(nrm((H, H)).astype(jnp.bfloat16))
        wi_l.append(nrm((H, I)).astype(jnp.bfloat16))
        wf_l.append(nrm((I, H)).astype(jnp.bfloat16))

    enc = {
        "wqkv": jnp.stack(wqkv_l),                         # (L, H, 3H) bf16
        "bqkv": jnp.zeros((L, 1, 3 * H), jnp.float32),     # q-part scale-folded (zeros)
        "wo": jnp.stack(wo_l),                             # (L, H, H) bf16
        "bo": jnp.zeros((L, 1, H), jnp.float32),
        "ln1_g": jnp.ones((L, 1, H), jnp.float32),
        "ln1_b": jnp.zeros((L, 1, H), jnp.float32),
        "wi": jnp.stack(wi_l),                             # (L, H, I) bf16
        "bi": jnp.zeros((L, 1, I), jnp.float32),
        "wf": jnp.stack(wf_l),                             # (L, I, H) bf16
        "bf": jnp.zeros((L, 1, H), jnp.float32),
        "ln2_g": jnp.ones((L, 1, H), jnp.float32),
        "ln2_b": jnp.zeros((L, 1, H), jnp.float32),
    }

    params = {
        "word_emb": nrm((cfg.vocab_size, H)),
        "pos_emb": nrm((cfg.max_pos, H)),
        "tok_emb": nrm((cfg.type_vocab, H)),
        "emb_ln_g": jnp.ones((1, H), jnp.float32),
        "emb_ln_b": jnp.zeros((1, H), jnp.float32),
        "enc": enc,
        "pool_w": nrm((H, H)).astype(jnp.bfloat16),
        "pool_b": jnp.zeros((1, H), jnp.float32),
        # regressor weight stored (out_dim, H + numeric_dim), PyTorch layout
        "reg_wt": nrm((cfg.output_dim, H + cfg.numeric_dim)),
        "reg_b": jnp.zeros((1, cfg.output_dim), jnp.float32),
    }
    return params


def bert_for_regression_forward(params, cfg, input_ids, token_type_ids,
                                attention_mask, numeric_features=None, labels=None):
    B, S = input_ids.shape
    H, nh, L = cfg.hidden, cfg.num_heads, cfg.num_layers

    # ---- embeddings (gather is glue); tiled LayerNorm in Pallas -------------
    pos_ids = jnp.arange(S, dtype=jnp.int32)
    emb = (jnp.take(params["word_emb"], input_ids, axis=0)
           + jnp.take(params["pos_emb"], pos_ids, axis=0)[None, :, :]
           + jnp.take(params["tok_emb"], token_type_ids, axis=0))
    x = layernorm(emb.reshape(B * S, H), params["emb_ln_g"], params["emb_ln_b"])
    # dropout(prob=0.1): identity in eval mode

    # ---- tiny (B,1,S) additive mask bias; broadcast happens inside kernel ---
    bias3 = ((1.0 - attention_mask.astype(jnp.float32)) * -10000.0).reshape(B, 1, S)

    # ---- transformer encoder: ONE fused pallas_call for all L layers --------
    x = encoder_stack(x, bias3, params["enc"], B=B, S=S, L=L, nh=nh)

    # ---- pooler + numeric concat + regressor: one fused head kernel ---------
    cls = x.reshape(B, S, H)[:, 0, :]                                   # (B, H)
    outputs = regression_head(cls, numeric_features,
                              params["pool_w"], params["pool_b"],
                              params["reg_wt"], params["reg_b"])         # (B, 1)

    if labels is not None:
        return jnp.mean(jnp.square(outputs.reshape(-1)
                                   - labels.reshape(-1).astype(jnp.float32)))
    return outputs


# ---------------------------------- main -------------------------------------

if __name__ == "__main__":
    cfg = Config()
    B, S = 2, 8

    key = jax.random.PRNGKey(0)
    k_par, k_ids, k_num = jax.random.split(key, 3)

    params = init_params(k_par, cfg)
    input_ids = jax.random.randint(k_ids, (B, S), 0, cfg.vocab_size, dtype=jnp.int32)
    token_type_ids = jnp.zeros((B, S), dtype=jnp.int32)
    attention_mask = jnp.ones((B, S), dtype=jnp.int32)
    numeric_features = jax.random.normal(k_num, (B, cfg.numeric_dim), dtype=jnp.float32)

    out = bert_for_regression_forward(params, cfg, input_ids, token_type_ids,
                                      attention_mask, numeric_features)
    out = jax.block_until_ready(out)
    assert out.shape == (B, cfg.output_dim) and out.dtype == jnp.float32
    print("KERNEL_OK")
</pallas_src>

<mosaic_0001>
module attributes {stable_mosaic.version = 11 : i64} {
  func.func @_layernorm_kernel(%arg0: i32, %arg1: memref<16x32xf32, #tpu.memory_space<vmem>>, %arg2: memref<1x32xf32, #tpu.memory_space<vmem>>, %arg3: memref<1x32xf32, #tpu.memory_space<vmem>>, %arg4: memref<16x32xf32, #tpu.memory_space<vmem>>) attributes {dimension_semantics = [#tpu.dimension_semantics<parallel>], iteration_bounds = array<i64: 1>, scalar_prefetch = 0 : i64, scratch_operands = 0 : i64, tpu.core_type = #tpu.core_type<tc>, window_params = [{transform_indices = @transform_0, window_bounds = array<i64: 16, 32>}, {pipeline_mode = #tpu.pipeline_mode<synchronous>, transform_indices = @transform_1, window_bounds = array<i64: 1, 32>}, {pipeline_mode = #tpu.pipeline_mode<synchronous>, transform_indices = @transform_2, window_bounds = array<i64: 1, 32>}, {transform_indices = @transform_3, window_bounds = array<i64: 16, 32>}]} {
    %c0 = arith.constant 0 : index
    %c0_0 = arith.constant 0 : index
    %0 = vector.load %arg1[%c0, %c0_0] : memref<16x32xf32, #tpu.memory_space<vmem>>, vector<16x32xf32>
    %c0_1 = arith.constant 0 : index
    %c0_2 = arith.constant 0 : index
    %1 = vector.load %arg2[%c0_1, %c0_2] : memref<1x32xf32, #tpu.memory_space<vmem>>, vector<1x32xf32>
    %c0_3 = arith.constant 0 : index
    %c0_4 = arith.constant 0 : index
    %2 = vector.load %arg3[%c0_3, %c0_4] : memref<1x32xf32, #tpu.memory_space<vmem>>, vector<1x32xf32>
    %cst = arith.constant dense<0.000000e+00> : vector<16xf32>
    %3 = vector.multi_reduction <add>, %0, %cst [1] : vector<16x32xf32> to vector<16xf32>
    %4 = vector.shape_cast %3 : vector<16xf32> to vector<16x1xf32>
    %cst_5 = arith.constant 3.200000e+01 : f32
    %5 = vector.broadcast %cst_5 : f32 to vector<16x1xf32>
    %6 = arith.divf %4, %5 : vector<16x1xf32>
    %7 = vector.broadcast %6 : vector<16x1xf32> to vector<16x32xf32>
    %8 = arith.subf %0, %7 : vector<16x32xf32>
    %9 = arith.mulf %8, %8 : vector<16x32xf32>
    %cst_6 = arith.constant dense<0.000000e+00> : vector<16xf32>
    %10 = vector.multi_reduction <add>, %9, %cst_6 [1] : vector<16x32xf32> to vector<16xf32>
    %11 = vector.shape_cast %10 : vector<16xf32> to vector<16x1xf32>
    %cst_7 = arith.constant 3.200000e+01 : f32
    %12 = vector.broadcast %cst_7 : f32 to vector<16x1xf32>
    %13 = arith.divf %11, %12 : vector<16x1xf32>
    %14 = vector.broadcast %6 : vector<16x1xf32> to vector<16x32xf32>
    %15 = arith.subf %0, %14 : vector<16x32xf32>
    %cst_8 = arith.constant 9.99999996E-13 : f32
    %16 = vector.broadcast %cst_8 : f32 to vector<16x1xf32>
    %17 = arith.addf %13, %16 : vector<16x1xf32>
    %18 = math.rsqrt %17 : vector<16x1xf32>
    %19 = vector.broadcast %18 : vector<16x1xf32> to vector<16x32xf32>
    %20 = arith.mulf %15, %19 : vector<16x32xf32>
    %21 = vector.broadcast %1 : vector<1x32xf32> to vector<16x32xf32>
    %22 = arith.mulf %20, %21 : vector<16x32xf32>
    %23 = vector.broadcast %2 : vector<1x32xf32> to vector<16x32xf32>
    %24 = arith.addf %22, %23 : vector<16x32xf32>
    %c0_9 = arith.constant 0 : index
    %c0_10 = arith.constant 0 : index
    %25 = vector.load %arg4[%c0_9, %c0_10] : memref<16x32xf32, #tpu.memory_space<vmem>>, vector<16x32xf32>
    tpu.vector_store %arg4[%c0_9, %c0_10], %24 {strides = array<i32>} : memref<16x32xf32, #tpu.memory_space<vmem>>, vector<16x32xf32>,
    return
  }
  func.func @transform_0(%arg0: i32) -> (i32, i32) {
    %c0_i32 = arith.constant 0 : i32
    %c0_i32_0 = arith.constant 0 : i32
    return %arg0, %c0_i32 : i32, i32
  }
  func.func @transform_1(%arg0: i32) -> (i32, i32) {
    %c0_i32 = arith.constant 0 : i32
    %c0_i32_0 = arith.constant 0 : i32
    %c0_i32_1 = arith.constant 0 : i32
    return %c0_i32, %c0_i32_0 : i32, i32
  }
  func.func @transform_2(%arg0: i32) -> (i32, i32) {
    %c0_i32 = arith.constant 0 : i32
    %c0_i32_0 = arith.constant 0 : i32
    %c0_i32_1 = arith.constant 0 : i32
    return %c0_i32, %c0_i32_0 : i32, i32
  }
  func.func @transform_3(%arg0: i32) -> (i32, i32) {
    %c0_i32 = arith.constant 0 : i32
    %c0_i32_0 = arith.constant 0 : i32
    return %arg0, %c0_i32 : i32, i32
  }
}

</mosaic_0001>

<bundles_post_ra>
// kernel: tpu_custom_call.1
= control target key start
LH: loop header
LB: loop body
LE: loop exit
PB: predicated region body
PF: predicated region fallthrough
CT: control target
= control target key end

     0   :  { %8 = vsyncpa [#allocation3], 0  ;;  %s275_s0 = inlined_call_operand.hbm [shape: f32[16,32], index: 0, kind: input, shape index: {}]   ;;  %s276_s1 = inlined_call_operand.hbm [shape: f32[1,32], index: 1, kind: input, shape index: {}]   ;;  %s277_s2 = inlined_call_operand.vmem [shape: f32[1,32], index: 2, kind: input, shape index: {}]   ;;  %s278_s3 = inlined_call_operand.hbm [shape: f32[16,32], index: 3, kind: output, shape index: {}]  }
   0x1   :  { %9 = vsyncpa [#allocation6], 0 }
   0x2   :  { %10 = vsyncpa [#allocation4], 0  ;;  %s15_s14 = sshll.u32 %s275_s0, 4  ;;  %s225_s15 = smov [#allocation2]   ;;  %s16_s14 = int_to_ptr.hbm [resolvable:$true] %s15_s14 }
   0x3   :  { %s17_s16 = sshll.u32 %s225_s15, 4  ;;  %s29_s19 = sshll.u32 %s276_s1, 4  ;;  %s18_s16 = int_to_ptr.vmem [resolvable:$true] %s17_s16  ;;  %s30_s19 = int_to_ptr.hbm [resolvable:$true] %s29_s19 }
   0x4   :  { %s226_s20 = smov 128   ;;  %s227_s21 = smov 8  }
   0x5   :  { %23 = dma.hbm_to_vmem [thread:$0]  %s16_s14, 256, %s18_s16, [#allocation3], %s226_s20, %s226_s20, %s227_s21  }
   0x6   :  { %s228_s22 = smov [#allocation5]  }
   0x7   :  { %s31_s23 = sshll.u32 %s228_s22, 4  ;;  %s32_s23 = int_to_ptr.vmem [resolvable:$true] %s31_s23 }
   0x8   :  { %34 = dma.hbm_to_vmem [thread:$0]  %s30_s19, 16, %s32_s23, [#allocation6]  }
   0x9   :  { %219 = dma.done.wait [#allocation3], 256  }
   0xa   :  { %220 = vsyncadd [#allocation3], 4294967040 }
   0xb   :  { %221 = dma.done.wait [#allocation6], 16  }
   0xc   :  { %222 = vsyncadd [#allocation6], 4294967280  ;;  %vm49_vm0 = vcmask 261120   ;;  %v45_v0 = vld [vmem:[#allocation2] sm:$0xff]  ;;  %v46_v2 = vld [vmem:[#allocation2 + $0x8] sm:$0xff]  ;;  %v229_v4 = vmov 32.0  }
   0xd   :  { %v50_v1 = vsel %vm49_vm0, %v45_v0, 0.0  ;;  %v53_v3 = vsel %vm49_vm0, %v46_v2, 0.0  ;;  %141 = vrcp.f32 %v229_v4  ;;  %v139_v35 = vld [vmem:[#allocation5] ss:$0 sm:$0xff]  ;;  %v140_v39 = vld [vmem:[%s277_s2] ss:$0 sm:$0xff] }
   0xe   :  { %51 = vadd.xlane.f32.xlu0 %v50_v1  ;;  %s230_s24 = smov [#allocation7]   ;;  %s119_s28 = sshll.u32 %s278_s3, 4  ;;  %s120_s28 = int_to_ptr.hbm [resolvable:$true] %s119_s28 }
   0xf   :  { %s117_s25 = sshll.u32 %s230_s24, 4  ;;  %s118_s25 = int_to_ptr.vmem [resolvable:$true] %s117_s25 }
  0x13   :  { %v142_v5 = vpop.eup %141 }
  0x14   :  { %v57_v6 = vmul.f32 32.0, %v142_v5  ;;  %vm61_vm1 = vweird.f32 %v142_v5 }
  0x16   :  { %54 = vadd.xlane.f32.xlu0 %v53_v3  ;;  %v58_v7 = vsub.f32 1.0, %v57_v6 }
  0x18   :  { %v59_v8 = vmul.f32 %v142_v5, %v58_v7 }
  0x1a   :  { %v60_v9 = vadd.f32 %v142_v5, %v59_v8 }
  0x1c   :  { %v62_v10 = vsel %vm61_vm1, %v142_v5, %v60_v9 }
  0x81   :  { %v52_v11 = vpop.xlane.xlu0 %51 }
  0x82   :  { %v63_v12 = vmul.f32 %v62_v10, %v52_v11 }
  0x84   :  { %v65_v13 = vsub.f32 %v45_v0, %v63_v12 }
  0x86   :  { %v67_v14 = vmul.f32 %v65_v13, %v65_v13 }
  0x88   :  { %v69_v15 = vsel %vm49_vm0, %v67_v14, 0.0 }
  0x89   :  { %70 = vadd.xlane.f32.xlu1 %v69_v15  ;;  %v55_v16 = vpop.xlane.xlu0 %54 }
  0x8a   :  { %v64_v17 = vmul.f32 %v62_v10, %v55_v16 }
  0x8c   :  { %v66_v18 = vsub.f32 %v46_v2, %v64_v17 }
  0x8e   :  { %v68_v19 = vmul.f32 %v66_v18, %v66_v18 }
  0x90   :  { %v72_v20 = vsel %vm49_vm0, %v68_v19, 0.0 }
  0x91   :  { %73 = vadd.xlane.f32.xlu1 %v72_v20 }
  0xfc   :  { %v71_v21 = vpop.xlane.xlu1 %70 }
  0xfd   :  { %v75_v22 = vmul.f32 %v71_v21, %v62_v10 }
  0xff   :  { %v77_v23 = vadd.f32 1e-12, %v75_v22 }
 0x101   :  { %143 = vrsqrt.f32 %v77_v23  ;;  %vm85_vm3 = vweird.f32 %v77_v23 }
 0x104   :  { %v74_v24 = vpop.xlane.xlu1 %73 }
 0x105   :  { %v76_v25 = vmul.f32 %v74_v24, %v62_v10 }
 0x107   :  { %v144_v26 = vpop.eup %143  ;;  %v78_v27 = vadd.f32 1e-12, %v76_v25 }
 0x108   :  { %v80_v28 = vmul.f32 %v144_v26, %v77_v23  ;;  %vm86_vm2 = vweird.f32 %v144_v26 }
 0x109   :  { %145 = vrsqrt.f32 %v78_v27  ;;  %vm87_vm4 = vmor %vm85_vm3, %vm86_vm2  ;;  %vm95_vm6 = vweird.f32 %v78_v27 }
 0x10a   :  { %v81_v29 = vmul.f32 %v144_v26, %v80_v28 }
 0x10c   :  { %v82_v30 = vmul.f32 0.5, %v81_v29 }
 0x10e   :  { %v83_v31 = vsub.f32 1.5, %v82_v30 }
 0x10f   :  { %v146_v32 = vpop.eup %145 }
 0x110   :  { %v84_v33 = vmul.f32 %v144_v26, %v83_v31  ;;  %v90_v34 = vmul.f32 %v146_v32, %v78_v27  ;;  %vm96_vm5 = vweird.f32 %v146_v32 }
 0x111   :  { %vm97_vm7 = vmor %vm95_vm6, %vm96_vm5 }
 0x112   :  { %v88_v36 = vsel %vm87_vm4, %v144_v26, %v84_v33  ;;  %v91_v37 = vmul.f32 %v146_v32, %v90_v34 }
 0x113   :  { %v99_v38 = vmul.f32 %v88_v36, %v65_v13 }
 0x114   :  { %v92_v40 = vmul.f32 0.5, %v91_v37 }
 0x115   :  { %v104_v41 = vmul.f32 %v139_v35, %v99_v38 }
 0x116   :  { %v93_v42 = vsub.f32 1.5, %v92_v40 }
 0x117   :  { %v109_v43 = vadd.f32 %v140_v39, %v104_v41 }
 0x118   :  { %v94_v44 = vmul.f32 %v146_v32, %v93_v42 }
 0x119   :  { %111 = vst.msk [vmem:[#allocation7] sm:$0xff] %vm49_vm0, %v109_v43 }
 0x11a   :  { %v98_v45 = vsel %vm97_vm7, %v146_v32, %v94_v44 }
 0x11b   :  { %v100_v46 = vmul.f32 %v98_v45, %v66_v18 }
 0x11d   :  { %v105_v47 = vmul.f32 %v139_v35, %v100_v46 }
 0x11f   :  { %v110_v48 = vadd.f32 %v140_v39, %v105_v47 }
 0x121   :  { %112 = vst.msk [vmem:[#allocation7 + $0x8] sm:$0xff] %vm49_vm0, %v110_v48 }
 0x122   :  { %125 = dma.vmem_to_hbm [thread:$0]  %s118_s25, 256, %s120_s28, [#allocation4], %s226_s20, %s226_s20, %s227_s21  }
 0x123   :  { %223 = dma.done.wait [#allocation4], 256  }
 0x124   :  { %224 = vsyncadd [#allocation4], 4294967040 }
 0x125   :  { %130 = vsyncpa [#allocation3], 1 }
 0x126   :  { %131 = vsyncpa [#allocation6], 1 }
 0x127   :  { %132 = vsyncpa [#allocation4], 1 }

</bundles_post_ra>
